<compile_context>
chip_gen: v7x
topology: tpu7x:2x2x1
jax: 0.10.0
libtpu: 0.0.40
codegen_flags: <defaults>
</compile_context>

<pallas_src>
import jax
import jax.numpy as jnp
from jax.experimental import pallas as pl
from jax.experimental.pallas import tpu as pltpu

IN_FEATURES = 19
HIDDEN = 35
OUT_FEATURES = 1
NUM_BLOCKS = 2


def _round_up(n, m):
    return ((n + m - 1) // m) * m


def resnet_kernel(x_ref,
                  w0_ref, b0_ref,
                  w1a_ref, b1a_ref, w1b_ref, b1b_ref,
                  w2a_ref, b2a_ref, w2b_ref, b2b_ref,
                  wf_ref, bf_ref,
                  o_ref):
    """One batch tile.  Activations are [features, TB] (batch on the lane axis).

    Weights are bf16 [out_features, in_features] (PyTorch layout); biases are
    f32 [out, 1].  Dots run with bf16 operands + f32 accumulation; all
    elementwise math (bias add, ReLU, residual add) is done in f32.
    """
    x = x_ref[...]                                        # [19, TB] bf16

    def linear(w_ref, b_ref, a):                          # W @ a + b  (f32 out)
        return (jnp.dot(w_ref[...], a.astype(jnp.bfloat16),
                        preferred_element_type=jnp.float32)
                + b_ref[...])

    # initial layer
    h = linear(w0_ref, b0_ref, x)                         # [35, TB] f32

    # residual block 1
    t = jnp.maximum(h, 0.0)
    t = linear(w1a_ref, b1a_ref, t)
    t = jnp.maximum(t, 0.0)
    t = linear(w1b_ref, b1b_ref, t)
    h = h + t

    # residual block 2
    t = jnp.maximum(h, 0.0)
    t = linear(w2a_ref, b2a_ref, t)
    t = jnp.maximum(t, 0.0)
    t = linear(w2b_ref, b2b_ref, t)
    h = h + t

    # final layer -> [1, TB]: lane-dense row store (no masked column stores)
    o_ref[...] = linear(wf_ref, bf_ref, h)


def similarity_embedding(x, params, *, tile_b=8192, features_major=False):
    """x: [B, 19] float32 (or [19, B] if features_major) -> [B, 1] float32."""
    (w0, b0, w1a, b1a, w1b, b1b, w2a, b2a, w2b, b2b, wf, bf) = params

    B = x.shape[1] if features_major else x.shape[0]

    # Weights -> bf16, PyTorch-native [out, in]; biases stay f32, [out, 1].
    weights = [p.astype(jnp.bfloat16).T for p in (w0, w1a, w1b, w2a, w2b, wf)]
    biases = [p.astype(jnp.float32).T for p in (b0, b1a, b1b, b2a, b2b, bf)]
    pt = [weights[0], biases[0],
          weights[1], biases[1], weights[2], biases[2],
          weights[3], biases[3], weights[4], biases[4],
          weights[5], biases[5]]

    # Batch tile:
    #   * >= 128 so the [1, TB] output store is lane-dense,
    #   * capped at ceil(B/4) (rounded to 128) so v7x's two TensorCores always
    #     have >= 2 grid steps to share (no effect on v5e/v6e),
    #   * default 8192 amortizes the ~600-cycle per-step overhead while staying
    #     tiny in VMEM on every generation (including v7x's 64 MiB).
    TB = min(tile_b, _round_up(max(pl.cdiv(B, 4), 1), 128))
    TB = max(TB, 128)
    num_tiles = pl.cdiv(B, TB)
    b_pad = num_tiles * TB

    # Input in bf16 (MXU-native, halves x DMA), features-major [19, b_pad].
    x = x.astype(jnp.bfloat16)
    if features_major:
        x_t = x
        if b_pad != B:
            x_t = jnp.pad(x_t, ((0, 0), (0, b_pad - B)))
    else:
        if b_pad != B:
            x = jnp.pad(x, ((0, b_pad - B), (0, 0)))
        x_t = x.T                                         # [19, b_pad]

    in_specs = [pl.BlockSpec((IN_FEATURES, TB), lambda i: (0, i))]
    # Parameters: full-shape blocks, constant index_map -> DMA'd once, resident.
    in_specs += [pl.BlockSpec(p.shape, lambda i: (0, 0)) for p in pt]
    out_specs = pl.BlockSpec((OUT_FEATURES, TB), lambda i: (0, i))

    param_bytes = sum(int(p.size) * p.dtype.itemsize for p in pt)
    flops = 2 * b_pad * (IN_FEATURES * HIDDEN
                         + 2 * NUM_BLOCKS * HIDDEN * HIDDEN
                         + HIDDEN * OUT_FEATURES)
    bytes_accessed = (b_pad * IN_FEATURES * 2      # bf16 input
                      + b_pad * OUT_FEATURES * 4   # f32 output
                      + param_bytes)

    out = pl.pallas_call(
        resnet_kernel,
        out_shape=jax.ShapeDtypeStruct((OUT_FEATURES, b_pad), jnp.float32),
        grid=(num_tiles,),
        in_specs=in_specs,
        out_specs=out_specs,
        compiler_params=pltpu.CompilerParams(
            dimension_semantics=("parallel",)),
        cost_estimate=pl.CostEstimate(flops=flops,
                                      transcendentals=0,
                                      bytes_accessed=bytes_accessed),
    )(x_t, *pt)

    return out[:, :B].T                                   # [B, 1]


def init_params(key):
    """Deterministic synthetic parameters (shapes match the PyTorch module)."""
    ks = jax.random.split(key, 13)

    def lin(kw, kb, fan_in, fan_out):
        bound = 1.0 / jnp.sqrt(fan_in)
        w = jax.random.uniform(kw, (fan_in, fan_out), jnp.float32, -bound, bound)
        b = jax.random.uniform(kb, (1, fan_out), jnp.float32, -bound, bound)
        return w, b

    w0, b0 = lin(ks[0], ks[1], IN_FEATURES, HIDDEN)
    w1a, b1a = lin(ks[2], ks[3], HIDDEN, HIDDEN)
    w1b, b1b = lin(ks[4], ks[5], HIDDEN, HIDDEN)
    w2a, b2a = lin(ks[6], ks[7], HIDDEN, HIDDEN)
    w2b, b2b = lin(ks[8], ks[9], HIDDEN, HIDDEN)
    wf, bf = lin(ks[10], ks[11], HIDDEN, OUT_FEATURES)
    return (w0, b0, w1a, b1a, w1b, b1b, w2a, b2a, w2b, b2b, wf, bf)


def reference(x, params):
    """Pure-JAX f32 reference of the same forward pass (weights stored [in, out])."""
    (w0, b0, w1a, b1a, w1b, b1b, w2a, b2a, w2b, b2b, wf, bf) = params
    h = x @ w0 + b0
    t = jnp.maximum(h, 0.0) @ w1a + b1a
    t = jnp.maximum(t, 0.0) @ w1b + b1b
    h = h + t
    t = jnp.maximum(h, 0.0) @ w2a + b2a
    t = jnp.maximum(t, 0.0) @ w2b + b2b
    h = h + t
    return h @ wf + bf


if __name__ == "__main__":
    key = jax.random.PRNGKey(0)
    k_x, k_p, k_x2 = jax.random.split(key, 3)
    params = init_params(k_p)

    # bf16 matmul operands -> compare to the f32 reference with loosened tolerance.
    TOL = 5e-2

    # Small single-tile check (TB collapses to 128, grid of 1).
    B = 8
    x = jax.random.normal(k_x, (B, IN_FEATURES), jnp.float32)
    out = jax.block_until_ready(similarity_embedding(x, params))
    ref = reference(x, params)
    assert out.shape == (B, OUT_FEATURES)
    assert jnp.allclose(out, ref, atol=TOL, rtol=TOL)

    # Multi-tile check: B not divisible by the tile — exercises the batch grid,
    # zero-padding, resident bf16 weight specs and the parallel dimension
    # semantics (>= 2 grid steps so both v7x TensorCores would get work).
    B2 = 300
    x2 = jax.random.normal(k_x2, (B2, IN_FEATURES), jnp.float32)
    out2 = jax.block_until_ready(similarity_embedding(x2, params))
    ref2 = reference(x2, params)
    assert out2.shape == (B2, OUT_FEATURES)
    assert jnp.allclose(out2, ref2, atol=TOL, rtol=TOL)

    print("KERNEL_OK")
</pallas_src>

<mosaic_0001>
module attributes {stable_mosaic.version = 11 : i64} {
  func.func @resnet_kernel(%arg0: i32, %arg1: memref<19x128xbf16, #tpu.memory_space<vmem>>, %arg2: memref<35x19xbf16, #tpu.memory_space<vmem>>, %arg3: memref<35x1xf32, #tpu.memory_space<vmem>>, %arg4: memref<35x35xbf16, #tpu.memory_space<vmem>>, %arg5: memref<35x1xf32, #tpu.memory_space<vmem>>, %arg6: memref<35x35xbf16, #tpu.memory_space<vmem>>, %arg7: memref<35x1xf32, #tpu.memory_space<vmem>>, %arg8: memref<35x35xbf16, #tpu.memory_space<vmem>>, %arg9: memref<35x1xf32, #tpu.memory_space<vmem>>, %arg10: memref<35x35xbf16, #tpu.memory_space<vmem>>, %arg11: memref<35x1xf32, #tpu.memory_space<vmem>>, %arg12: memref<1x35xbf16, #tpu.memory_space<vmem>>, %arg13: memref<1x1xf32, #tpu.memory_space<vmem>>, %arg14: memref<1x128xf32, #tpu.memory_space<vmem>>) attributes {dimension_semantics = [#tpu.dimension_semantics<parallel>], iteration_bounds = array<i64: 1>, scalar_prefetch = 0 : i64, scratch_operands = 0 : i64, tpu.core_type = #tpu.core_type<tc>, window_params = [{transform_indices = @transform_0, window_bounds = array<i64: 19, 128>}, {pipeline_mode = #tpu.pipeline_mode<synchronous>, transform_indices = @transform_1, window_bounds = array<i64: 35, 19>}, {pipeline_mode = #tpu.pipeline_mode<synchronous>, transform_indices = @transform_2, window_bounds = array<i64: 35, 1>}, {pipeline_mode = #tpu.pipeline_mode<synchronous>, transform_indices = @transform_3, window_bounds = array<i64: 35, 35>}, {pipeline_mode = #tpu.pipeline_mode<synchronous>, transform_indices = @transform_4, window_bounds = array<i64: 35, 1>}, {pipeline_mode = #tpu.pipeline_mode<synchronous>, transform_indices = @transform_5, window_bounds = array<i64: 35, 35>}, {pipeline_mode = #tpu.pipeline_mode<synchronous>, transform_indices = @transform_6, window_bounds = array<i64: 35, 1>}, {pipeline_mode = #tpu.pipeline_mode<synchronous>, transform_indices = @transform_7, window_bounds = array<i64: 35, 35>}, {pipeline_mode = #tpu.pipeline_mode<synchronous>, transform_indices = @transform_8, window_bounds = array<i64: 35, 1>}, {pipeline_mode = #tpu.pipeline_mode<synchronous>, transform_indices = @transform_9, window_bounds = array<i64: 35, 35>}, {pipeline_mode = #tpu.pipeline_mode<synchronous>, transform_indices = @transform_10, window_bounds = array<i64: 35, 1>}, {pipeline_mode = #tpu.pipeline_mode<synchronous>, transform_indices = @transform_11, window_bounds = array<i64: 1, 35>}, {pipeline_mode = #tpu.pipeline_mode<synchronous>, transform_indices = @transform_12, window_bounds = array<i64: 1, 1>}, {transform_indices = @transform_13, window_bounds = array<i64: 1, 128>}]} {
    %c0 = arith.constant 0 : index
    %c0_0 = arith.constant 0 : index
    %0 = vector.load %arg1[%c0, %c0_0] : memref<19x128xbf16, #tpu.memory_space<vmem>>, vector<19x128xbf16>
    %c0_1 = arith.constant 0 : index
    %c0_2 = arith.constant 0 : index
    %1 = vector.load %arg2[%c0_1, %c0_2] : memref<35x19xbf16, #tpu.memory_space<vmem>>, vector<35x19xbf16>
    %cst = arith.constant dense<0.000000e+00> : vector<35x128xf32>
    %2 = tpu.matmul %1, %0, %cst {dimension_numbers = #tpu.dot_dimension_numbers<[1], [0], [0], [1], [0, 0, 1, 1], [], []>} : vector<35x19xbf16>, vector<19x128xbf16>, vector<35x128xf32> -> vector<35x128xf32>
    %c0_3 = arith.constant 0 : index
    %c0_4 = arith.constant 0 : index
    %3 = vector.load %arg3[%c0_3, %c0_4] : memref<35x1xf32, #tpu.memory_space<vmem>>, vector<35x1xf32>
    %4 = vector.broadcast %3 : vector<35x1xf32> to vector<35x128xf32>
    %5 = arith.addf %2, %4 : vector<35x128xf32>
    %cst_5 = arith.constant 0.000000e+00 : f32
    %6 = vector.broadcast %cst_5 : f32 to vector<35x128xf32>
    %7 = arith.maximumf %5, %6 : vector<35x128xf32>
    %c0_6 = arith.constant 0 : index
    %c0_7 = arith.constant 0 : index
    %8 = vector.load %arg4[%c0_6, %c0_7] : memref<35x35xbf16, #tpu.memory_space<vmem>>, vector<35x35xbf16>
    %9 = arith.truncf %7 : vector<35x128xf32> to vector<35x128xbf16>
    %cst_8 = arith.constant dense<0.000000e+00> : vector<35x128xf32>
    %10 = tpu.matmul %8, %9, %cst_8 {dimension_numbers = #tpu.dot_dimension_numbers<[1], [0], [0], [1], [0, 0, 1, 1], [], []>} : vector<35x35xbf16>, vector<35x128xbf16>, vector<35x128xf32> -> vector<35x128xf32>
    %c0_9 = arith.constant 0 : index
    %c0_10 = arith.constant 0 : index
    %11 = vector.load %arg5[%c0_9, %c0_10] : memref<35x1xf32, #tpu.memory_space<vmem>>, vector<35x1xf32>
    %12 = vector.broadcast %11 : vector<35x1xf32> to vector<35x128xf32>
    %13 = arith.addf %10, %12 : vector<35x128xf32>
    %cst_11 = arith.constant 0.000000e+00 : f32
    %14 = vector.broadcast %cst_11 : f32 to vector<35x128xf32>
    %15 = arith.maximumf %13, %14 : vector<35x128xf32>
    %c0_12 = arith.constant 0 : index
    %c0_13 = arith.constant 0 : index
    %16 = vector.load %arg6[%c0_12, %c0_13] : memref<35x35xbf16, #tpu.memory_space<vmem>>, vector<35x35xbf16>
    %17 = arith.truncf %15 : vector<35x128xf32> to vector<35x128xbf16>
    %cst_14 = arith.constant dense<0.000000e+00> : vector<35x128xf32>
    %18 = tpu.matmul %16, %17, %cst_14 {dimension_numbers = #tpu.dot_dimension_numbers<[1], [0], [0], [1], [0, 0, 1, 1], [], []>} : vector<35x35xbf16>, vector<35x128xbf16>, vector<35x128xf32> -> vector<35x128xf32>
    %c0_15 = arith.constant 0 : index
    %c0_16 = arith.constant 0 : index
    %19 = vector.load %arg7[%c0_15, %c0_16] : memref<35x1xf32, #tpu.memory_space<vmem>>, vector<35x1xf32>
    %20 = vector.broadcast %19 : vector<35x1xf32> to vector<35x128xf32>
    %21 = arith.addf %18, %20 : vector<35x128xf32>
    %22 = arith.addf %5, %21 : vector<35x128xf32>
    %cst_17 = arith.constant 0.000000e+00 : f32
    %23 = vector.broadcast %cst_17 : f32 to vector<35x128xf32>
    %24 = arith.maximumf %22, %23 : vector<35x128xf32>
    %c0_18 = arith.constant 0 : index
    %c0_19 = arith.constant 0 : index
    %25 = vector.load %arg8[%c0_18, %c0_19] : memref<35x35xbf16, #tpu.memory_space<vmem>>, vector<35x35xbf16>
    %26 = arith.truncf %24 : vector<35x128xf32> to vector<35x128xbf16>
    %cst_20 = arith.constant dense<0.000000e+00> : vector<35x128xf32>
    %27 = tpu.matmul %25, %26, %cst_20 {dimension_numbers = #tpu.dot_dimension_numbers<[1], [0], [0], [1], [0, 0, 1, 1], [], []>} : vector<35x35xbf16>, vector<35x128xbf16>, vector<35x128xf32> -> vector<35x128xf32>
    %c0_21 = arith.constant 0 : index
    %c0_22 = arith.constant 0 : index
    %28 = vector.load %arg9[%c0_21, %c0_22] : memref<35x1xf32, #tpu.memory_space<vmem>>, vector<35x1xf32>
    %29 = vector.broadcast %28 : vector<35x1xf32> to vector<35x128xf32>
    %30 = arith.addf %27, %29 : vector<35x128xf32>
    %cst_23 = arith.constant 0.000000e+00 : f32
    %31 = vector.broadcast %cst_23 : f32 to vector<35x128xf32>
    %32 = arith.maximumf %30, %31 : vector<35x128xf32>
    %c0_24 = arith.constant 0 : index
    %c0_25 = arith.constant 0 : index
    %33 = vector.load %arg10[%c0_24, %c0_25] : memref<35x35xbf16, #tpu.memory_space<vmem>>, vector<35x35xbf16>
    %34 = arith.truncf %32 : vector<35x128xf32> to vector<35x128xbf16>
    %cst_26 = arith.constant dense<0.000000e+00> : vector<35x128xf32>
    %35 = tpu.matmul %33, %34, %cst_26 {dimension_numbers = #tpu.dot_dimension_numbers<[1], [0], [0], [1], [0, 0, 1, 1], [], []>} : vector<35x35xbf16>, vector<35x128xbf16>, vector<35x128xf32> -> vector<35x128xf32>
    %c0_27 = arith.constant 0 : index
    %c0_28 = arith.constant 0 : index
    %36 = vector.load %arg11[%c0_27, %c0_28] : memref<35x1xf32, #tpu.memory_space<vmem>>, vector<35x1xf32>
    %37 = vector.broadcast %36 : vector<35x1xf32> to vector<35x128xf32>
    %38 = arith.addf %35, %37 : vector<35x128xf32>
    %39 = arith.addf %22, %38 : vector<35x128xf32>
    %c0_29 = arith.constant 0 : index
    %c0_30 = arith.constant 0 : index
    %40 = vector.load %arg12[%c0_29, %c0_30] : memref<1x35xbf16, #tpu.memory_space<vmem>>, vector<1x35xbf16>
    %41 = arith.truncf %39 : vector<35x128xf32> to vector<35x128xbf16>
    %cst_31 = arith.constant dense<0.000000e+00> : vector<1x128xf32>
    %42 = tpu.matmul %40, %41, %cst_31 {dimension_numbers = #tpu.dot_dimension_numbers<[1], [0], [0], [1], [0, 0, 1, 1], [], []>} : vector<1x35xbf16>, vector<35x128xbf16>, vector<1x128xf32> -> vector<1x128xf32>
    %c0_32 = arith.constant 0 : index
    %c0_33 = arith.constant 0 : index
    %43 = vector.load %arg13[%c0_32, %c0_33] : memref<1x1xf32, #tpu.memory_space<vmem>>, vector<1x1xf32>
    %44 = vector.broadcast %43 : vector<1x1xf32> to vector<1x128xf32>
    %45 = arith.addf %42, %44 : vector<1x128xf32>
    %c0_34 = arith.constant 0 : index
    %c0_35 = arith.constant 0 : index
    %46 = vector.load %arg14[%c0_34, %c0_35] : memref<1x128xf32, #tpu.memory_space<vmem>>, vector<1x128xf32>
    tpu.vector_store %arg14[%c0_34, %c0_35], %45 {strides = array<i32>} : memref<1x128xf32, #tpu.memory_space<vmem>>, vector<1x128xf32>,
    return
  }
  func.func @transform_0(%arg0: i32) -> (i32, i32) {
    %c0_i32 = arith.constant 0 : i32
    %c0_i32_0 = arith.constant 0 : i32
    return %c0_i32, %arg0 : i32, i32
  }
  func.func @transform_1(%arg0: i32) -> (i32, i32) {
    %c0_i32 = arith.constant 0 : i32
    %c0_i32_0 = arith.constant 0 : i32
    %c0_i32_1 = arith.constant 0 : i32
    return %c0_i32, %c0_i32_0 : i32, i32
  }
  func.func @transform_2(%arg0: i32) -> (i32, i32) {
    %c0_i32 = arith.constant 0 : i32
    %c0_i32_0 = arith.constant 0 : i32
    %c0_i32_1 = arith.constant 0 : i32
    return %c0_i32, %c0_i32_0 : i32, i32
  }
  func.func @transform_3(%arg0: i32) -> (i32, i32) {
    %c0_i32 = arith.constant 0 : i32
    %c0_i32_0 = arith.constant 0 : i32
    %c0_i32_1 = arith.constant 0 : i32
    return %c0_i32, %c0_i32_0 : i32, i32
  }
  func.func @transform_4(%arg0: i32) -> (i32, i32) {
    %c0_i32 = arith.constant 0 : i32
    %c0_i32_0 = arith.constant 0 : i32
    %c0_i32_1 = arith.constant 0 : i32
    return %c0_i32, %c0_i32_0 : i32, i32
  }
  func.func @transform_5(%arg0: i32) -> (i32, i32) {
    %c0_i32 = arith.constant 0 : i32
    %c0_i32_0 = arith.constant 0 : i32
    %c0_i32_1 = arith.constant 0 : i32
    return %c0_i32, %c0_i32_0 : i32, i32
  }
  func.func @transform_6(%arg0: i32) -> (i32, i32) {
    %c0_i32 = arith.constant 0 : i32
    %c0_i32_0 = arith.constant 0 : i32
    %c0_i32_1 = arith.constant 0 : i32
    return %c0_i32, %c0_i32_0 : i32, i32
  }
  func.func @transform_7(%arg0: i32) -> (i32, i32) {
    %c0_i32 = arith.constant 0 : i32
    %c0_i32_0 = arith.constant 0 : i32
    %c0_i32_1 = arith.constant 0 : i32
    return %c0_i32, %c0_i32_0 : i32, i32
  }
  func.func @transform_8(%arg0: i32) -> (i32, i32) {
    %c0_i32 = arith.constant 0 : i32
    %c0_i32_0 = arith.constant 0 : i32
    %c0_i32_1 = arith.constant 0 : i32
    return %c0_i32, %c0_i32_0 : i32, i32
  }
  func.func @transform_9(%arg0: i32) -> (i32, i32) {
    %c0_i32 = arith.constant 0 : i32
    %c0_i32_0 = arith.constant 0 : i32
    %c0_i32_1 = arith.constant 0 : i32
    return %c0_i32, %c0_i32_0 : i32, i32
  }
  func.func @transform_10(%arg0: i32) -> (i32, i32) {
    %c0_i32 = arith.constant 0 : i32
    %c0_i32_0 = arith.constant 0 : i32
    %c0_i32_1 = arith.constant 0 : i32
    return %c0_i32, %c0_i32_0 : i32, i32
  }
  func.func @transform_11(%arg0: i32) -> (i32, i32) {
    %c0_i32 = arith.constant 0 : i32
    %c0_i32_0 = arith.constant 0 : i32
    %c0_i32_1 = arith.constant 0 : i32
    return %c0_i32, %c0_i32_0 : i32, i32
  }
  func.func @transform_12(%arg0: i32) -> (i32, i32) {
    %c0_i32 = arith.constant 0 : i32
    %c0_i32_0 = arith.constant 0 : i32
    %c0_i32_1 = arith.constant 0 : i32
    return %c0_i32, %c0_i32_0 : i32, i32
  }
  func.func @transform_13(%arg0: i32) -> (i32, i32) {
    %c0_i32 = arith.constant 0 : i32
    %c0_i32_0 = arith.constant 0 : i32
    return %c0_i32, %arg0 : i32, i32
  }
}

</mosaic_0001>

<bundles_post_ra>
// kernel: tpu_custom_call.1
= control target key start
LH: loop header
LB: loop body
LE: loop exit
PB: predicated region body
PF: predicated region fallthrough
CT: control target
= control target key end

     0   :  { %s1313_s0 = inlined_call_operand.vmem [shape: bf16[19,128], index: 0, kind: input, shape index: {}]   ;;  %s1314_s1 = inlined_call_operand.vmem [shape: bf16[35,19], index: 1, kind: input, shape index: {}]   ;;  %s1315_s2 = inlined_call_operand.vmem [shape: f32[35,1], index: 2, kind: input, shape index: {}]   ;;  %s1316_s3 = inlined_call_operand.vmem [shape: bf16[35,35], index: 3, kind: input, shape index: {}]   ;;  %s1317_s4 = inlined_call_operand.vmem [shape: f32[35,1], index: 4, kind: input, shape index: {}]   ;;  %s1318_s5 = inlined_call_operand.vmem [shape: bf16[35,35], index: 5, kind: input, shape index: {}]   ;;  %s1319_s6 = inlined_call_operand.vmem [shape: f32[35,1], index: 6, kind: input, shape index: {}]   ;;  %s1320_s7 = inlined_call_operand.vmem [shape: bf16[35,35], index: 7, kind: input, shape index: {}]   ;;  %s1321_s8 = inlined_call_operand.vmem [shape: f32[35,1], index: 8, kind: input, shape index: {}]   ;;  %s1322_s9 = inlined_call_operand.vmem [shape: bf16[35,35], index: 9, kind: input, shape index: {}]   ;;  %s1323_s10 = inlined_call_operand.vmem [shape: f32[35,1], index: 10, kind: input, shape index: {}]   ;;  %s1324_s11 = inlined_call_operand.vmem [shape: bf16[1,35], index: 11, kind: input, shape index: {}]   ;;  %s1325_s12 = inlined_call_operand.<no memory space> [shape: f32[1,1], index: 12, kind: input, shape index: {}]   ;;  %s1326_s13 = inlined_call_operand.hbm [shape: f32[1,128], index: 13, kind: output, shape index: {}]  }
   0x1   :  { %v18_v0 = vstv %s1325_s12 }
   0x2   :  { %19 = vst [vmem:[#allocation2] sm:$0x1] %v18_v0 }
   0x3   :  { %v938_v1 = vld [vmem:[%s1313_s0] sm:$0xff]   ;;  %v979_v2 = vmov 0.0   ;;  %v939_v3 = vld [vmem:[%s1313_s0 + $0x8] ss:$0 sps:$4 sm:$0x33]   ;;  %vm118_vm0 = vcmask 1040384  }
   0x4   :  { %829 = vmatprep.subr.bf16.mxu0 %v979_v2  ;;  %927 = vmatprep.subr.bf16.mxu1 %v979_v2  ;;  %vm119_vm1 = vcmask 1041408   ;;  %v980_v4 = vmov 65535   ;;  %vm981_vm2 = vmmov 0   ;;  %v56_v8 = vld [vmem:[%s1315_s2] sm:$0xff]  ;;  %v982_v11 = vmov 0   ;;  %v58_v12 = vld [vmem:[%s1315_s2 + $0x10] sm:$0xff] }
   0x5   :  { %830 = vmatpush3.bf16.msra.mxu0 %v938_v1  ;;  %929 = vmatpush3.bf16.msra.mxu1 %v938_v1  ;;  %v120_v5 = vsel %vm118_vm0, 4294967295, %v980_v4  ;;  %v940_v9 = vld [vmem:[%s1314_s1] sm:$0xff]   ;;  %v941_v10 = vld [vmem:[%s1314_s1 + $0x10] ss:$0 sps:$4 sm:$0x33]   ;;  %vm108_vm3 = vcmask 154624  }
   0x6   :  { %831 = vmatprep.subr.bf16.mxu0 %v979_v2  ;;  %928 = vmatprep.subr.bf16.mxu1 %v979_v2  ;;  %v1067_v6 = vsel %vm119_vm1, %v120_v5, 0  ;;  %v57_v13 = vld [vmem:[%s1315_s2 + $0x8] sm:$0xff]  ;;  %v59_v14 = vld [vmem:[%s1315_s2 + $0x18] sm:$0xff]  ;;  %v60_v15 = vld [vmem:[%s1315_s2 + $0x20] sm:$0x7] }
   0x7   :  { %833 = vmatprep.mubr.msk.bf16.mxu0 %vm981_vm2, %v979_v2  ;;  %841 = vmatprep.mubr.msk.bf16.mxu1 %vm981_vm2, %v979_v2  ;;  %v123_v7 = vand.u32 %v939_v3, %v1067_v6  ;;  %v194_v16 = vld [vmem:[%s1317_s4] sm:$0xff]  ;;  %v942_v17 = vld [vmem:[%s1314_s1 + $0x8] sm:$0xff]   ;;  %v196_v19 = vld [vmem:[%s1317_s4 + $0x10] sm:$0xff] }
   0x8   :  { %936 = vset.pattern.permute.xlu0 %v982_v11  ;;  %937 = vset.pattern.permute.xlu1 %v982_v11  ;;  %v195_v18 = vld [vmem:[%s1317_s4 + $0x8] sm:$0xff]  ;;  %v197_v20 = vld [vmem:[%s1317_s4 + $0x18] sm:$0xff]  ;;  %v198_v21 = vld [vmem:[%s1317_s4 + $0x20] sm:$0x7] }
   0x9   :  { %832 = vmatpush3.bf16.msra.mxu0 %v123_v7  ;;  %930 = vmatpush3.bf16.msra.mxu1 %v123_v7 }
   0xa   :  { %63 = vperm.xlu0 %936, %v56_v8   ;;  %73 = vperm.xlu1 %937, %v58_v12  }
   0xb   :  { %845 = vmatprep.subr.bf16.mxu1 %v979_v2  ;;  %863 = vmatprep.subr.bf16.mxu0 %v979_v2 }
   0xc   :  { %834 = vmatmul.mubr.msk.bf16.vlgmr.msra.gmra.mrb[0].mxu0 %vm108_vm3, %v940_v9  ;;  %842 = vmatmul.mubr.msk.bf16.vlgmr.msra.gmra.mrb[0].mxu1 %vm108_vm3, %v941_v10 }
   0xd   :  { %837 = vmatprep.mubr.msk.bf16.mxu0 %vm981_vm2, %v979_v2  ;;  %851 = vmatprep.mubr.msk.bf16.mxu1 %vm981_vm2, %v979_v2 }
   0xe   :  { %68 = vperm.xlu0 %936, %v57_v13   ;;  %78 = vperm.xlu1 %937, %v59_v14  }
  0x12   :  { %83 = vperm.xlu0 %936, %v60_v15   ;;  %201 = vperm.xlu1 %937, %v194_v16  }
  0x14   :  { %838 = vmatmul.mubr.msk.bf16.gmra.mrb[4].mxu0 %vm108_vm3, %v942_v17 }
  0x15   :  { %869 = vmatprep.mubr.msk.bf16.mxu0 %vm981_vm2, %v979_v2 }
  0x16   :  { %206 = vperm.xlu0 %936, %v195_v18   ;;  %211 = vperm.xlu1 %937, %v196_v19  }
  0x17   :  { %20 = vsyncpa [#allocation4], 0  ;;  %v319_v22 = vld [vmem:[%s1319_s6] sm:$0xff]  ;;  %v320_v23 = vld [vmem:[%s1319_s6 + $0x8] sm:$0xff]  ;;  %vm237_vm4 = vcmask 285696   ;;  %s983_s21 = smov [#allocation3]  }
  0x18   :  { %v321_v24 = vld [vmem:[%s1319_s6 + $0x10] sm:$0xff]  ;;  %v322_v25 = vld [vmem:[%s1319_s6 + $0x18] sm:$0xff]  ;;  %v323_v26 = vld [vmem:[%s1319_s6 + $0x20] sm:$0x7] }
  0x19   :  { %v448_v27 = vld [vmem:[%s1321_s8] sm:$0xff]  ;;  %v449_v28 = vld [vmem:[%s1321_s8 + $0x8] sm:$0xff]  ;;  %v450_v29 = vld [vmem:[%s1321_s8 + $0x10] sm:$0xff] }
  0x1a   :  { %216 = vperm.xlu0 %936, %v197_v20   ;;  %221 = vperm.xlu1 %937, %v198_v21   ;;  %v451_v30 = vld [vmem:[%s1321_s8 + $0x18] sm:$0xff]  ;;  %v452_v31 = vld [vmem:[%s1321_s8 + $0x20] sm:$0x7]  ;;  %v573_v33 = vld [vmem:[%s1323_s10 + $0x8] sm:$0xff]  ;;  %s755_s8 = sshll.u32 %s983_s21, 4  ;;  %s756_s8 = int_to_ptr.vmem [resolvable:$true] %s755_s8 }
  0x1b   :  { %v572_v32 = vld [vmem:[%s1323_s10] sm:$0xff]  ;;  %v574_v34 = vld [vmem:[%s1323_s10 + $0x10] sm:$0xff]  ;;  %v575_v35 = vld [vmem:[%s1323_s10 + $0x18] sm:$0xff]  ;;  %s955_s22 = scalar_lea.vmem %s756_s8, 16  ;;  %p960_p1 = scmp.lt.s32.totalorder %s756_s8, %s756_s8 }
  0x1c   :  { %v576_v36 = vld [vmem:[%s1323_s10 + $0x20] sm:$0x7]  ;;  %v944_v8 = vld [vmem:[%s1316_s3 + $0x8] sm:$0xff]   ;;  %v945_v9 = vld [vmem:[%s1316_s3 + $0x10] ss:$0 sps:$4 sm:$0x33]   ;;  %p956_p0 = scmp.ne.s32.totalorder %s756_s8, %s955_s22 }
  0x1d   :  { %v692_v37 = vld [vmem:[#allocation2] sm:$0x1]  ;;  %s959_s10 = scalar_lea.vmem %s756_s8, 32 }
  0x1e   :  { %326 = vperm.xlu0 %936, %v319_v22   ;;  %331 = vperm.xlu1 %937, %v320_v23   ;;  %v943_v7 = vld [vmem:[%s1316_s3] sm:$0xff]   ;;  %p961_p2 = scmp.lt.s32.totalorder %s959_s10, %s955_s22 }
  0x20   :  { %p962_p3 = por %p961_p2, %p960_p1 }
  0x22   :  { %336 = vperm.xlu0 %936, %v321_v24   ;;  %341 = vperm.xlu1 %937, %v322_v25   ;;  %p963_p4 = pnand %p962_p3, %p956_p0 }
  0x26   :  { %346 = vperm.xlu0 %936, %v323_v26   ;;  %455 = vperm.xlu1 %937, %v448_v27  }
  0x2a   :  { %460 = vperm.xlu0 %936, %v449_v28   ;;  %465 = vperm.xlu1 %937, %v450_v29  }
  0x2e   :  { %470 = vperm.xlu0 %936, %v451_v30   ;;  %475 = vperm.xlu1 %937, %v452_v31  }
  0x32   :  { %579 = vperm.xlu0 %936, %v572_v32   ;;  %584 = vperm.xlu1 %937, %v573_v33  }
  0x36   :  { %589 = vperm.xlu0 %936, %v574_v34   ;;  %594 = vperm.xlu1 %937, %v575_v35  }
  0x3a   :  { %599 = vperm.xlu0 %936, %v576_v36   ;;  %695 = vperm.xlu1 %937, %v692_v37  }
  0x89   :  { %v64_v38 = vpop.permute.xlu0 %63  ;;  %v74_v50 = vpop.permute.xlu1 %73 }
  0x8d   :  { %v69_v39 = vpop.permute.xlu0 %68  ;;  %v79_v59 = vpop.permute.xlu1 %78 }
  0x91   :  { %v84_v53 = vpop.permute.xlu0 %83  ;;  %v202_v10 = vpop.permute.xlu1 %201 }
  0x95   :  { %v207_v14 = vpop.permute.xlu0 %206  ;;  %v212_v21 = vpop.permute.xlu1 %211 }
  0x99   :  { %v217_v25 = vpop.permute.xlu0 %216  ;;  %v222_v32 = vpop.permute.xlu1 %221 }
  0xdf   :  { %v159_v40 = vpop.f32.mrb[0].mxu0  ;;  %v175_v41 = vpop.f32.mrb[0].mxu1 }
  0xe0   :  { %v1169_v42 = vadd.f32 %v159_v40, %v64_v38  ;;  %v835_v43 = vpop.f32.mrb[1].mxu0  ;;  %v843_v44 = vpop.f32.mrb[1].mxu1  ;;  %v1175_v55 = vadd.f32 %v175_v41, %v84_v53  ;;  %v946_v41 = vld [vmem:[%s1318_s5] sm:$0xff]  }
  0xe1   :  { %v162_v45 = vpop.f32.mrb[2].mxu0  ;;  %v178_v46 = vpop.f32.mrb[2].mxu1  ;;  %v947_v43 = vld [vmem:[%s1318_s5 + $0x8] sm:$0xff]   ;;  %v948_v44 = vld [vmem:[%s1318_s5 + $0x10] ss:$0 sps:$4 sm:$0x33]  }
  0xe2   :  { %v1171_v47 = vadd.f32 %v162_v45, %v69_v39  ;;  %v836_v48 = vpop.f32.mrb[3].mxu0  ;;  %v844_v49 = vpop.f32.mrb[3].mxu1  ;;  %v181_v51 = vmax.f32 %v1169_v42, 0.0  ;;  %v185_v61 = vmax.f32 %v1175_v55, 0.0 }
  0xe3   :  { %v327_v45 = vpop.permute.xlu0 %326 }
  0xe4   :  { %v182_v52 = vmax.f32 %v1171_v47, 0.0  ;;  %v193_v3 = vpack.c.bf16 %v185_v61, %v185_v61 }
  0xe6   :  { %v191_v54 = vpack.c.bf16 %v182_v52, %v181_v51  ;;  %v248_v5 = vand.u32 %v193_v3, %v1067_v6 }
  0xe7   :  { %v167_v56 = vpop.f32.mrb[4].mxu0 }
  0xe8   :  { %v1177_v57 = vadd.f32 %v167_v56, %v74_v50  ;;  %v839_v58 = vpop.f32.mrb[5].mxu0  ;;  %846 = vmatpush3.bf16.msra.mxu1 %v191_v54  ;;  %v332_v50 = vpop.permute.xlu1 %331 }
  0xe9   :  { %v170_v60 = vpop.f32.mrb[6].mxu0  ;;  %847 = vmatprep.subr.bf16.mxu1 %v979_v2 }
  0xea   :  { %v1181_v62 = vadd.f32 %v170_v60, %v79_v59  ;;  %v840_v63 = vpop.f32.mrb[7].mxu0  ;;  %v183_v0 = vmax.f32 %v1177_v57, 0.0  ;;  %v337_v60 = vpop.permute.xlu0 %336 }
  0xec   :  { %v184_v1 = vmax.f32 %v1181_v62, 0.0  ;;  %v342_v3 = vpop.permute.xlu1 %341 }
  0xee   :  { %v192_v4 = vpack.c.bf16 %v184_v1, %v183_v0 }
  0xf0   :  { %848 = vmatpush3.bf16.msra.mxu1 %v192_v4 }
  0xf1   :  { %849 = vmatprep.subr.bf16.mxu1 %v979_v2 }
  0xf4   :  { %850 = vmatpush3.bf16.msra.mxu1 %v248_v5 }
  0xf5   :  { %881 = vmatprep.subr.bf16.mxu1 %v979_v2 }
  0xf7   :  { %852 = vmatmul.mubr.msk.bf16.vlgmr.msra.gmra.mrb[4].mxu1 %vm237_vm4, %v943_v7 }
  0xf8   :  { %855 = vmatprep.mubr.msk.bf16.mxu1 %vm981_vm2, %v979_v2 }
  0xff   :  { %856 = vmatmul.mubr.msk.bf16.gmra.mrb[8].mxu1 %vm237_vm4, %v944_v8 }
 0x100   :  { %859 = vmatprep.mubr.msk.bf16.mxu1 %vm981_vm2, %v979_v2 }
 0x107   :  { %860 = vmatmul.mubr.msk.bf16.gmra.mrb[12].mxu1 %vm237_vm4, %v945_v9 }
 0x108   :  { %887 = vmatprep.mubr.msk.bf16.mxu1 %vm981_vm2, %v979_v2 }
 0x1ca   :  { %v284_v11 = vpop.f32.mrb[4].mxu1 }
 0x1cb   :  { %v285_v12 = vadd.f32 %v284_v11, %v202_v10  ;;  %v853_v13 = vpop.f32.mrb[5].mxu1  ;;  %v347_v10 = vpop.permute.xlu0 %346 }
 0x1cc   :  { %v287_v15 = vpop.f32.mrb[6].mxu1 }
 0x1cd   :  { %v288_v16 = vadd.f32 %v287_v15, %v207_v14  ;;  %v854_v17 = vpop.f32.mrb[7].mxu1  ;;  %v306_v18 = vmax.f32 %v285_v12, 0.0 }
 0x1cf   :  { %v307_v19 = vmax.f32 %v288_v16, 0.0 }
 0x1d1   :  { %v316_v20 = vpack.c.bf16 %v307_v19, %v306_v18  ;;  %v949_v19 = vld [vmem:[%s1320_s7] sm:$0xff]  }
 0x1d2   :  { %v292_v22 = vpop.f32.mrb[8].mxu1 }
 0x1d3   :  { %v293_v23 = vadd.f32 %v292_v22, %v212_v21  ;;  %v857_v24 = vpop.f32.mrb[9].mxu1  ;;  %864 = vmatpush3.bf16.msra.mxu0 %v316_v20  ;;  %v951_v20 = vld [vmem:[%s1320_s7 + $0x10] ss:$0 sps:$4 sm:$0x33]   ;;  %v456_v21 = vpop.permute.xlu1 %455 }
 0x1d4   :  { %v295_v26 = vpop.f32.mrb[10].mxu1  ;;  %865 = vmatprep.subr.bf16.mxu0 %v979_v2 }
 0x1d5   :  { %v296_v27 = vadd.f32 %v295_v26, %v217_v25  ;;  %v858_v28 = vpop.f32.mrb[11].mxu1  ;;  %v308_v29 = vmax.f32 %v293_v23, 0.0  ;;  %v461_v25 = vpop.permute.xlu0 %460 }
 0x1d7   :  { %v309_v30 = vmax.f32 %v296_v27, 0.0 }
 0x1d9   :  { %v317_v31 = vpack.c.bf16 %v309_v30, %v308_v29 }
 0x1da   :  { %v300_v33 = vpop.f32.mrb[12].mxu1 }
 0x1db   :  { %v301_v34 = vadd.f32 %v300_v33, %v222_v32  ;;  %v861_v35 = vpop.f32.mrb[13].mxu1  ;;  %866 = vmatpush3.bf16.msra.mxu0 %v317_v31  ;;  %v466_v32 = vpop.permute.xlu1 %465 }
 0x1dc   :  { %v303_v36 = vpop.f32.mrb[14].mxu1  ;;  %867 = vmatprep.subr.bf16.mxu0 %v979_v2 }
 0x1dd   :  { %v310_v37 = vmax.f32 %v301_v34, 0.0  ;;  %v862_v38 = vpop.f32.mrb[15].mxu1  ;;  %v471_v36 = vpop.permute.xlu0 %470 }
 0x1df   :  { %v318_v39 = vpack.c.bf16 %v310_v37, %v310_v37 }
 0x1e1   :  { %v372_v40 = vand.u32 %v318_v39, %v1067_v6 }
 0x1e3   :  { %868 = vmatpush3.bf16.msra.mxu0 %v372_v40 }
 0x1e4   :  { %899 = vmatprep.subr.bf16.mxu0 %v979_v2 }
 0x1e6   :  { %870 = vmatmul.mubr.msk.bf16.vlgmr.msra.gmra.mrb[8].mxu0 %vm237_vm4, %v946_v41 }
 0x1e7   :  { %873 = vmatprep.mubr.msk.bf16.mxu0 %vm981_vm2, %v979_v2 }
 0x1ee   :  { %874 = vmatmul.mubr.msk.bf16.gmra.mrb[12].mxu0 %vm237_vm4, %v947_v43 }
 0x1ef   :  { %877 = vmatprep.mubr.msk.bf16.mxu0 %vm981_vm2, %v979_v2 }
 0x1f6   :  { %878 = vmatmul.mubr.msk.bf16.gmra.mrb[16].mxu0 %vm237_vm4, %v948_v44  ;;  %v476_v44 = vpop.permute.xlu1 %475 }
 0x1f7   :  { %905 = vmatprep.mubr.msk.bf16.mxu0 %vm981_vm2, %v979_v2 }
 0x2b9   :  { %v408_v46 = vpop.f32.mrb[8].mxu0 }
 0x2ba   :  { %v409_v48 = vadd.f32 %v408_v46, %v327_v45  ;;  %v871_v49 = vpop.f32.mrb[9].mxu0 }
 0x2bb   :  { %v411_v51 = vpop.f32.mrb[10].mxu0 }
 0x2bc   :  { %v1229_v52 = vadd.f32 %v409_v48, %v1169_v42  ;;  %v412_v53 = vadd.f32 %v411_v51, %v332_v50  ;;  %v872_v54 = vpop.f32.mrb[11].mxu0 }
 0x2be   :  { %v1232_v56 = vadd.f32 %v412_v53, %v1171_v47  ;;  %v435_v58 = vmax.f32 %v1229_v52, 0.0 }
 0x2c0   :  { %v436_v59 = vmax.f32 %v1232_v56, 0.0 }
 0x2c1   :  { %v416_v61 = vpop.f32.mrb[12].mxu0 }
 0x2c2   :  { %v445_v63 = vpack.c.bf16 %v436_v59, %v435_v58  ;;  %v417_v0 = vadd.f32 %v416_v61, %v337_v60  ;;  %v875_v1 = vpop.f32.mrb[13].mxu0  ;;  %v952_v58 = vld [vmem:[%s1322_s9] sm:$0xff]   ;;  %v953_v59 = vld [vmem:[%s1322_s9 + $0x8] sm:$0xff]   ;;  %v954_v60 = vld [vmem:[%s1322_s9 + $0x10] ss:$0 sps:$4 sm:$0x33]   ;;  %v580_v61 = vpop.permute.xlu0 %579 }
 0x2c3   :  { %v419_v4 = vpop.f32.mrb[14].mxu0 }
 0x2c4   :  { %v1237_v5 = vadd.f32 %v417_v0, %v1177_v57  ;;  %v420_v42 = vadd.f32 %v419_v4, %v342_v3  ;;  %v876_v7 = vpop.f32.mrb[15].mxu0  ;;  %882 = vmatpush3.bf16.msra.mxu1 %v445_v63  ;;  %v585_v3 = vpop.permute.xlu1 %584 }
 0x2c5   :  { %883 = vmatprep.subr.bf16.mxu1 %v979_v2 }
 0x2c6   :  { %v1241_v47 = vadd.f32 %v420_v42, %v1181_v62  ;;  %v437_v8 = vmax.f32 %v1237_v5, 0.0 }
 0x2c8   :  { %v438_v9 = vmax.f32 %v1241_v47, 0.0 }
 0x2c9   :  { %v424_v11 = vpop.f32.mrb[16].mxu0 }
 0x2ca   :  { %v446_v12 = vpack.c.bf16 %v438_v9, %v437_v8  ;;  %v425_v13 = vadd.f32 %v424_v11, %v347_v10  ;;  %v879_v14 = vpop.f32.mrb[17].mxu0  ;;  %v590_v11 = vpop.permute.xlu0 %589 }
 0x2cb   :  { %v427_v15 = vpop.f32.mrb[18].mxu0 }
 0x2cc   :  { %v1246_v57 = vadd.f32 %v425_v13, %v1175_v55  ;;  %v880_v16 = vpop.f32.mrb[19].mxu0  ;;  %884 = vmatpush3.bf16.msra.mxu1 %v446_v12  ;;  %v950_v55 = vld [vmem:[%s1320_s7 + $0x8] sm:$0xff]   ;;  %v595_v15 = vpop.permute.xlu1 %594 }
 0x2cd   :  { %885 = vmatprep.subr.bf16.mxu1 %v979_v2 }
 0x2ce   :  { %v439_v62 = vmax.f32 %v1246_v57, 0.0 }
 0x2d0   :  { %v447_v17 = vpack.c.bf16 %v439_v62, %v439_v62 }
 0x2d2   :  { %v501_v18 = vand.u32 %v447_v17, %v1067_v6 }
 0x2d4   :  { %886 = vmatpush3.bf16.msra.mxu1 %v501_v18 }
 0x2d5   :  { %917 = vmatprep.subr.bf16.mxu1 %v979_v2 }
 0x2d7   :  { %888 = vmatmul.mubr.msk.bf16.vlgmr.msra.gmra.mrb[16].mxu1 %vm237_vm4, %v949_v19 }
 0x2d8   :  { %891 = vmatprep.mubr.msk.bf16.mxu1 %vm981_vm2, %v979_v2 }
 0x2df   :  { %892 = vmatmul.mubr.msk.bf16.gmra.mrb[20].mxu1 %vm237_vm4, %v950_v55 }
 0x2e0   :  { %895 = vmatprep.mubr.msk.bf16.mxu1 %vm981_vm2, %v979_v2 }
 0x2e7   :  { %896 = vmatmul.mubr.msk.bf16.gmra.mrb[24].mxu1 %vm237_vm4, %v951_v20 }
 0x2e8   :  { %923 = vmatprep.mubr.msk.bf16.mxu1 %vm981_vm2, %v979_v2 }
 0x3aa   :  { %v537_v22 = vpop.f32.mrb[16].mxu1 }
 0x3ab   :  { %v538_v23 = vadd.f32 %v537_v22, %v456_v21  ;;  %v889_v24 = vpop.f32.mrb[17].mxu1 }
 0x3ac   :  { %v540_v26 = vpop.f32.mrb[18].mxu1 }
 0x3ad   :  { %v541_v27 = vadd.f32 %v540_v26, %v461_v25  ;;  %v890_v28 = vpop.f32.mrb[19].mxu1  ;;  %v559_v29 = vmax.f32 %v538_v23, 0.0 }
 0x3af   :  { %v560_v30 = vmax.f32 %v541_v27, 0.0 }
 0x3b1   :  { %v569_v31 = vpack.c.bf16 %v560_v30, %v559_v29  ;;  %v696_v29 = vpop.permute.xlu1 %695 }
 0x3b2   :  { %v545_v33 = vpop.f32.mrb[20].mxu1 }
 0x3b3   :  { %v546_v34 = vadd.f32 %v545_v33, %v466_v32  ;;  %v893_v35 = vpop.f32.mrb[21].mxu1  ;;  %900 = vmatpush3.bf16.msra.mxu0 %v569_v31 }
 0x3b4   :  { %v548_v37 = vpop.f32.mrb[22].mxu1  ;;  %901 = vmatprep.subr.bf16.mxu0 %v979_v2 }
 0x3b5   :  { %v549_v38 = vadd.f32 %v548_v37, %v471_v36  ;;  %v894_v39 = vpop.f32.mrb[23].mxu1  ;;  %v561_v40 = vmax.f32 %v546_v34, 0.0 }
 0x3b7   :  { %v562_v41 = vmax.f32 %v549_v38, 0.0 }
 0x3b9   :  { %v570_v43 = vpack.c.bf16 %v562_v41, %v561_v40 }
 0x3ba   :  { %v553_v45 = vpop.f32.mrb[24].mxu1 }
 0x3bb   :  { %v554_v46 = vadd.f32 %v553_v45, %v476_v44  ;;  %v897_v48 = vpop.f32.mrb[25].mxu1  ;;  %902 = vmatpush3.bf16.msra.mxu0 %v570_v43 }
 0x3bc   :  { %v556_v49 = vpop.f32.mrb[26].mxu1  ;;  %903 = vmatprep.subr.bf16.mxu0 %v979_v2 }
 0x3bd   :  { %v563_v50 = vmax.f32 %v554_v46, 0.0  ;;  %v898_v51 = vpop.f32.mrb[27].mxu1 }
 0x3bf   :  { %v571_v53 = vpack.c.bf16 %v563_v50, %v563_v50 }
 0x3c1   :  { %v625_v54 = vand.u32 %v571_v53, %v1067_v6 }
 0x3c3   :  { %904 = vmatpush3.bf16.msra.mxu0 %v625_v54 }
 0x3c6   :  { %906 = vmatmul.mubr.msk.bf16.vlgmr.msra.gmra.mrb[20].mxu0 %vm237_vm4, %v952_v58 }
 0x3c7   :  { %909 = vmatprep.mubr.msk.bf16.mxu0 %vm981_vm2, %v979_v2 }
 0x3ce   :  { %910 = vmatmul.mubr.msk.bf16.gmra.mrb[24].mxu0 %vm237_vm4, %v953_v59 }
 0x3cf   :  { %913 = vmatprep.mubr.msk.bf16.mxu0 %vm981_vm2, %v979_v2 }
 0x3d6   :  { %914 = vmatmul.mubr.msk.bf16.gmra.mrb[28].mxu0 %vm237_vm4, %v954_v60 }
 0x499   :  { %v661_v63 = vpop.f32.mrb[20].mxu0 }
 0x49a   :  { %v662_v0 = vadd.f32 %v661_v63, %v580_v61  ;;  %v907_v1 = vpop.f32.mrb[21].mxu0 }
 0x49b   :  { %v664_v4 = vpop.f32.mrb[22].mxu0 }
 0x49c   :  { %v665_v42 = vadd.f32 %v664_v4, %v585_v3  ;;  %v908_v7 = vpop.f32.mrb[23].mxu0  ;;  %v683_v8 = vadd.f32 %v662_v0, %v1229_v52  ;;  %v600_v52 = vpop.permute.xlu0 %599 }
 0x49e   :  { %v684_v9 = vadd.f32 %v665_v42, %v1232_v56 }
 0x4a0   :  { %v689_v10 = vpack.c.bf16 %v684_v9, %v683_v8 }
 0x4a1   :  { %v669_v12 = vpop.f32.mrb[24].mxu0 }
 0x4a2   :  { %v670_v13 = vadd.f32 %v669_v12, %v590_v11  ;;  %v911_v14 = vpop.f32.mrb[25].mxu0  ;;  %918 = vmatpush3.bf16.msra.mxu1 %v689_v10 }
 0x4a3   :  { %v672_v16 = vpop.f32.mrb[26].mxu0  ;;  %919 = vmatprep.subr.bf16.mxu1 %v979_v2 }
 0x4a4   :  { %v673_v62 = vadd.f32 %v672_v16, %v595_v15  ;;  %v912_v17 = vpop.f32.mrb[27].mxu0  ;;  %v685_v18 = vadd.f32 %v670_v13, %v1237_v5  ;;  %v688_v5 = vld [vmem:[%s1324_s11] sm:$0x1] }
 0x4a6   :  { %v686_v19 = vadd.f32 %v673_v62, %v1241_v47  ;;  %v698_v47 = vlaneseq }
 0x4a8   :  { %v690_v55 = vpack.c.bf16 %v686_v19, %v685_v18  ;;  %v699_v27 = vshrl.u32 %v698_v47, 7 }
 0x4a9   :  { %v677_v20 = vpop.f32.mrb[28].mxu0 }
 0x4aa   :  { %v678_v56 = vadd.f32 %v677_v20, %v600_v52  ;;  %v915_v21 = vpop.f32.mrb[29].mxu0  ;;  %920 = vmatpush3.bf16.msra.mxu1 %v690_v55  ;;  %v700_v28 = vsub.s32 0, %v699_v27 }
 0x4ab   :  { %v680_v22 = vpop.f32.mrb[30].mxu0  ;;  %921 = vmatprep.subr.bf16.mxu1 %v979_v2 }
 0x4ac   :  { %v687_v23 = vadd.f32 %v678_v56, %v1246_v57  ;;  %v916_v24 = vpop.f32.mrb[31].mxu0  ;;  %v701_v2 = vrot.slane %v696_v29, %v700_v28 }
 0x4ae   :  { %v691_v25 = vpack.c.bf16 %v687_v23, %v687_v23 }
 0x4b0   :  { %v706_v26 = vand.u32 %v691_v25, %v1067_v6 }
 0x4b2   :  { %922 = vmatpush3.bf16.msra.mxu1 %v706_v26 }
 0x4b5   :  { %924 = vmatmul.mubr.msk.bf16.vlgmr.msra.gmra.mrb[28].mxu1 %vm237_vm4, %v688_v5 }
 0x588   :  { %v742_v30 = vpop.f32.mrb[28].mxu1 }
 0x589   :  { %v743_v57 = vadd.f32 %v742_v30, %v701_v2  ;;  %v925_v31 = vpop.f32.mrb[29].mxu1 }
 0x58a   :  { %v745_v32 = vpop.f32.mrb[30].mxu1 }
 0x58b   :  { %748 = vst [vmem:[#allocation3] sm:$0x1] %v743_v57  ;;  %v926_v6 = vpop.f32.mrb[31].mxu1 }
 0x58c   :  { %966 = shalt.err (!%p963_p4)
}
 0x58d   :  { %s967_s24 = scalar_lea.hbm %s1326_s13, 16 }
 0x58e   :  { %p968_p5 = scmp.ne.s32.totalorder %s1326_s13, %s967_s24  ;;  %p971_p6 = scmp.lt.u32.totalorder %s967_s24, %s1326_s13 }
 0x590   :  { %p973_p7 = pnand %p971_p6, %p968_p5 }
 0x592   :  { %976 = shalt.err (!%p973_p7)
}
 0x593   :  { %758 = dma.vmem_to_hbm [thread:$0]  %s756_s8, 16, %s1326_s13, [#allocation4]  }
 0x594   :  { %977 = dma.done.wait [#allocation4], 16  }
 0x595   :  { %978 = vsyncadd [#allocation4], 4294967280 }
 0x596   :  { %762 = vsyncpa [#allocation4], 1 }

</bundles_post_ra>
